<compile_context>
chip_gen: v6e
topology: v6e:2x2x1
jax: 0.10.0
libtpu: 0.0.40
codegen_flags: <defaults>
</compile_context>

<pallas_src>
import jax
import jax.numpy as jnp
from jax.experimental import pallas as pl
from jax.experimental.pallas import tpu as pltpu

_LANES = 128          # vreg lane count
_SUBLANES = 8         # vreg sublane count (f32)
_MAX_TILE_ROWS = 256  # (256, 128) f32 block = 128 KiB per grid step


def _mlp_kernel(x_ref, w1_ref, b1_ref, w2_ref, b2_ref, o_ref):
    # x_ref / o_ref : (TILE_ROWS, 128) f32 VMEM — batch dense on sublanes+lanes.
    # w1_ref, b1_ref, w2_ref : (H,) f32 SMEM; b2_ref : (1,) f32 SMEM.
    x = x_ref[...]
    n_hidden = w1_ref.shape[0]                  # static at trace time
    y = jnp.zeros_like(x) + b2_ref[0]           # init with output bias (splat)
    # Statically unrolled hidden loop: scalar-splat weights from SMEM, pure VPU.
    for j in range(n_hidden):
        h = jnp.maximum(w1_ref[j] * x + b1_ref[j], 0.0)   # relu(hidden_j)
        y = y + h * w2_ref[j]
    o_ref[...] = y.astype(o_ref.dtype)


def _choose_tiling(n):
    """Return (tile_rows, n_rows) with n laid out as (n_rows, 128), n_rows a
    multiple of tile_rows and tile_rows a multiple of 8."""
    rows_min = pl.cdiv(n, _LANES)
    rows_min = pl.cdiv(rows_min, _SUBLANES) * _SUBLANES
    if rows_min <= _SUBLANES:
        tile_rows = _SUBLANES
    else:
        # At least 2 grid steps when the batch spans >1 granule, so the
        # "parallel" axis can be sharded across both v7x TensorCores;
        # cap the per-step tile at 32K elements (128 KiB f32).
        half = pl.cdiv(rows_min, 2)
        half = pl.cdiv(half, _SUBLANES) * _SUBLANES
        tile_rows = min(_MAX_TILE_ROWS, half)
    n_rows = pl.cdiv(rows_min, tile_rows) * tile_rows
    return tile_rows, n_rows


def _net_forward(x, w1, b1, w2, b2):
    """x: (N, n_feature) f32; w1: (n_feature, n_hidden); b1: (1, n_hidden);
       w2: (n_hidden, n_output); b2: (1, n_output). Returns (N, n_output) f32."""
    n, n_feature = x.shape
    n_hidden = w1.shape[1]
    n_output = w2.shape[1]
    # Kernel is specialized for the degenerate contractions of this module.
    assert n_feature == 1 and n_output == 1, "kernel specialized for Net(1, H, 1)"

    tile_rows, n_rows = _choose_tiling(n)
    n_pad = n_rows * _LANES

    # Batch dense on both vreg axes: (n_rows, 128) f32.
    x_2d = jnp.pad(x.reshape(n).astype(jnp.float32),
                   (0, n_pad - n)).reshape(n_rows, _LANES)
    # Scalar parameters -> flat SMEM arrays.
    w1_s = w1.reshape(n_hidden).astype(jnp.float32)
    b1_s = b1.reshape(n_hidden).astype(jnp.float32)
    w2_s = w2.reshape(n_hidden).astype(jnp.float32)
    b2_s = b2.reshape(1).astype(jnp.float32)

    out = pl.pallas_call(
        _mlp_kernel,
        out_shape=jax.ShapeDtypeStruct((n_rows, _LANES), jnp.float32),
        grid=(n_rows // tile_rows,),
        in_specs=[
            pl.BlockSpec((tile_rows, _LANES), lambda i: (i, 0)),   # x tile
            pl.BlockSpec(memory_space=pltpu.MemorySpace.SMEM),     # w1 (H,)
            pl.BlockSpec(memory_space=pltpu.MemorySpace.SMEM),     # b1 (H,)
            pl.BlockSpec(memory_space=pltpu.MemorySpace.SMEM),     # w2 (H,)
            pl.BlockSpec(memory_space=pltpu.MemorySpace.SMEM),     # b2 (1,)
        ],
        out_specs=pl.BlockSpec((tile_rows, _LANES), lambda i: (i, 0)),
        compiler_params=pltpu.CompilerParams(
            dimension_semantics=("parallel",)),
        cost_estimate=pl.CostEstimate(
            flops=5 * n_pad * n_hidden,
            transcendentals=0,
            bytes_accessed=4 * (2 * n_pad + 3 * n_hidden + 1)),
    )(x_2d, w1_s, b1_s, w2_s, b2_s)

    # Back to PyTorch layout (N, 1); padded elements are sliced off.
    return out.reshape(n_pad)[:n].reshape(n, n_output)


net_forward = jax.jit(_net_forward)


if __name__ == "__main__":
    # Shapes implied by the reference script: x = linspace(-1, 1, 100)[:, None],
    # Net(n_feature=1, n_hidden=10, n_output=1).
    n_feature, n_hidden, n_output = 1, 10, 1
    N = 100

    key = jax.random.PRNGKey(0)
    k1, k2, k3, k4 = jax.random.split(key, 4)
    # Deterministic init mimicking PyTorch's uniform(-1/sqrt(fan_in), 1/sqrt(fan_in)).
    bound1 = 1.0 / (n_feature ** 0.5)
    bound2 = 1.0 / (n_hidden ** 0.5)
    w1 = jax.random.uniform(k1, (n_feature, n_hidden), jnp.float32, -bound1, bound1)
    b1 = jax.random.uniform(k2, (1, n_hidden), jnp.float32, -bound1, bound1)
    w2 = jax.random.uniform(k3, (n_hidden, n_output), jnp.float32, -bound2, bound2)
    b2 = jax.random.uniform(k4, (1, n_output), jnp.float32, -bound2, bound2)

    # Same input as the reference: 100 points in [-1, 1], shape (100, 1).
    x = jnp.linspace(-1.0, 1.0, N, dtype=jnp.float32)[:, None]

    y = net_forward(x, w1, b1, w2, b2)
    y = jax.block_until_ready(y)

    # Cross-check against plain-JAX reference of the same math.
    ref = jnp.maximum(x @ w1 + b1, 0.0) @ w2 + b2
    assert y.shape == (N, n_output)
    assert jnp.allclose(y, ref, atol=1e-5, rtol=1e-5)

    # Also exercise a larger, multi-step grid path (>= 2 parallel steps).
    N_big = 5000
    xb = jnp.linspace(-1.0, 1.0, N_big, dtype=jnp.float32)[:, None]
    yb = jax.block_until_ready(net_forward(xb, w1, b1, w2, b2))
    refb = jnp.maximum(xb @ w1 + b1, 0.0) @ w2 + b2
    assert jnp.allclose(yb, refb, atol=1e-5, rtol=1e-5)

    print("KERNEL_OK")
</pallas_src>

<mosaic_0001>
module attributes {stable_mosaic.version = 11 : i64} {
  func.func @_mlp_kernel(%arg0: i32, %arg1: memref<8x128xf32, #tpu.memory_space<vmem>>, %arg2: memref<10xf32, #tpu.memory_space<smem>>, %arg3: memref<10xf32, #tpu.memory_space<smem>>, %arg4: memref<10xf32, #tpu.memory_space<smem>>, %arg5: memref<1xf32, #tpu.memory_space<smem>>, %arg6: memref<8x128xf32, #tpu.memory_space<vmem>>) attributes {dimension_semantics = [#tpu.dimension_semantics<parallel>], iteration_bounds = array<i64: 1>, scalar_prefetch = 0 : i64, scratch_operands = 0 : i64, tpu.core_type = #tpu.core_type<tc>, window_params = [{transform_indices = @transform_0, window_bounds = array<i64: 8, 128>}, {transform_indices = @transform_1, window_bounds = array<i64: 10>}, {transform_indices = @transform_2, window_bounds = array<i64: 10>}, {transform_indices = @transform_3, window_bounds = array<i64: 10>}, {transform_indices = @transform_4, window_bounds = array<i64: 1>}, {transform_indices = @transform_5, window_bounds = array<i64: 8, 128>}]} {
    %c0 = arith.constant 0 : index
    %c0_0 = arith.constant 0 : index
    %0 = vector.load %arg1[%c0, %c0_0] : memref<8x128xf32, #tpu.memory_space<vmem>>, vector<8x128xf32>
    %cst = arith.constant 0.000000e+00 : f32
    %1 = vector.broadcast %cst : f32 to vector<8x128xf32>
    %c0_1 = arith.constant 0 : index
    %2 = memref.load %arg5[%c0_1] : memref<1xf32, #tpu.memory_space<smem>>
    %3 = vector.broadcast %2 : f32 to vector<8x128xf32>
    %4 = arith.addf %1, %3 : vector<8x128xf32>
    %c0_2 = arith.constant 0 : index
    %5 = memref.load %arg2[%c0_2] : memref<10xf32, #tpu.memory_space<smem>>
    %6 = vector.broadcast %5 : f32 to vector<8x128xf32>
    %7 = arith.mulf %6, %0 : vector<8x128xf32>
    %c0_3 = arith.constant 0 : index
    %8 = memref.load %arg3[%c0_3] : memref<10xf32, #tpu.memory_space<smem>>
    %9 = vector.broadcast %8 : f32 to vector<8x128xf32>
    %10 = arith.addf %7, %9 : vector<8x128xf32>
    %cst_4 = arith.constant 0.000000e+00 : f32
    %11 = vector.broadcast %cst_4 : f32 to vector<8x128xf32>
    %12 = arith.maximumf %10, %11 : vector<8x128xf32>
    %c0_5 = arith.constant 0 : index
    %13 = memref.load %arg4[%c0_5] : memref<10xf32, #tpu.memory_space<smem>>
    %14 = vector.broadcast %13 : f32 to vector<8x128xf32>
    %15 = arith.mulf %12, %14 : vector<8x128xf32>
    %16 = arith.addf %4, %15 : vector<8x128xf32>
    %c1 = arith.constant 1 : index
    %17 = memref.load %arg2[%c1] : memref<10xf32, #tpu.memory_space<smem>>
    %18 = vector.broadcast %17 : f32 to vector<8x128xf32>
    %19 = arith.mulf %18, %0 : vector<8x128xf32>
    %c1_6 = arith.constant 1 : index
    %20 = memref.load %arg3[%c1_6] : memref<10xf32, #tpu.memory_space<smem>>
    %21 = vector.broadcast %20 : f32 to vector<8x128xf32>
    %22 = arith.addf %19, %21 : vector<8x128xf32>
    %cst_7 = arith.constant 0.000000e+00 : f32
    %23 = vector.broadcast %cst_7 : f32 to vector<8x128xf32>
    %24 = arith.maximumf %22, %23 : vector<8x128xf32>
    %c1_8 = arith.constant 1 : index
    %25 = memref.load %arg4[%c1_8] : memref<10xf32, #tpu.memory_space<smem>>
    %26 = vector.broadcast %25 : f32 to vector<8x128xf32>
    %27 = arith.mulf %24, %26 : vector<8x128xf32>
    %28 = arith.addf %16, %27 : vector<8x128xf32>
    %c2 = arith.constant 2 : index
    %29 = memref.load %arg2[%c2] : memref<10xf32, #tpu.memory_space<smem>>
    %30 = vector.broadcast %29 : f32 to vector<8x128xf32>
    %31 = arith.mulf %30, %0 : vector<8x128xf32>
    %c2_9 = arith.constant 2 : index
    %32 = memref.load %arg3[%c2_9] : memref<10xf32, #tpu.memory_space<smem>>
    %33 = vector.broadcast %32 : f32 to vector<8x128xf32>
    %34 = arith.addf %31, %33 : vector<8x128xf32>
    %cst_10 = arith.constant 0.000000e+00 : f32
    %35 = vector.broadcast %cst_10 : f32 to vector<8x128xf32>
    %36 = arith.maximumf %34, %35 : vector<8x128xf32>
    %c2_11 = arith.constant 2 : index
    %37 = memref.load %arg4[%c2_11] : memref<10xf32, #tpu.memory_space<smem>>
    %38 = vector.broadcast %37 : f32 to vector<8x128xf32>
    %39 = arith.mulf %36, %38 : vector<8x128xf32>
    %40 = arith.addf %28, %39 : vector<8x128xf32>
    %c3 = arith.constant 3 : index
    %41 = memref.load %arg2[%c3] : memref<10xf32, #tpu.memory_space<smem>>
    %42 = vector.broadcast %41 : f32 to vector<8x128xf32>
    %43 = arith.mulf %42, %0 : vector<8x128xf32>
    %c3_12 = arith.constant 3 : index
    %44 = memref.load %arg3[%c3_12] : memref<10xf32, #tpu.memory_space<smem>>
    %45 = vector.broadcast %44 : f32 to vector<8x128xf32>
    %46 = arith.addf %43, %45 : vector<8x128xf32>
    %cst_13 = arith.constant 0.000000e+00 : f32
    %47 = vector.broadcast %cst_13 : f32 to vector<8x128xf32>
    %48 = arith.maximumf %46, %47 : vector<8x128xf32>
    %c3_14 = arith.constant 3 : index
    %49 = memref.load %arg4[%c3_14] : memref<10xf32, #tpu.memory_space<smem>>
    %50 = vector.broadcast %49 : f32 to vector<8x128xf32>
    %51 = arith.mulf %48, %50 : vector<8x128xf32>
    %52 = arith.addf %40, %51 : vector<8x128xf32>
    %c4 = arith.constant 4 : index
    %53 = memref.load %arg2[%c4] : memref<10xf32, #tpu.memory_space<smem>>
    %54 = vector.broadcast %53 : f32 to vector<8x128xf32>
    %55 = arith.mulf %54, %0 : vector<8x128xf32>
    %c4_15 = arith.constant 4 : index
    %56 = memref.load %arg3[%c4_15] : memref<10xf32, #tpu.memory_space<smem>>
    %57 = vector.broadcast %56 : f32 to vector<8x128xf32>
    %58 = arith.addf %55, %57 : vector<8x128xf32>
    %cst_16 = arith.constant 0.000000e+00 : f32
    %59 = vector.broadcast %cst_16 : f32 to vector<8x128xf32>
    %60 = arith.maximumf %58, %59 : vector<8x128xf32>
    %c4_17 = arith.constant 4 : index
    %61 = memref.load %arg4[%c4_17] : memref<10xf32, #tpu.memory_space<smem>>
    %62 = vector.broadcast %61 : f32 to vector<8x128xf32>
    %63 = arith.mulf %60, %62 : vector<8x128xf32>
    %64 = arith.addf %52, %63 : vector<8x128xf32>
    %c5 = arith.constant 5 : index
    %65 = memref.load %arg2[%c5] : memref<10xf32, #tpu.memory_space<smem>>
    %66 = vector.broadcast %65 : f32 to vector<8x128xf32>
    %67 = arith.mulf %66, %0 : vector<8x128xf32>
    %c5_18 = arith.constant 5 : index
    %68 = memref.load %arg3[%c5_18] : memref<10xf32, #tpu.memory_space<smem>>
    %69 = vector.broadcast %68 : f32 to vector<8x128xf32>
    %70 = arith.addf %67, %69 : vector<8x128xf32>
    %cst_19 = arith.constant 0.000000e+00 : f32
    %71 = vector.broadcast %cst_19 : f32 to vector<8x128xf32>
    %72 = arith.maximumf %70, %71 : vector<8x128xf32>
    %c5_20 = arith.constant 5 : index
    %73 = memref.load %arg4[%c5_20] : memref<10xf32, #tpu.memory_space<smem>>
    %74 = vector.broadcast %73 : f32 to vector<8x128xf32>
    %75 = arith.mulf %72, %74 : vector<8x128xf32>
    %76 = arith.addf %64, %75 : vector<8x128xf32>
    %c6 = arith.constant 6 : index
    %77 = memref.load %arg2[%c6] : memref<10xf32, #tpu.memory_space<smem>>
    %78 = vector.broadcast %77 : f32 to vector<8x128xf32>
    %79 = arith.mulf %78, %0 : vector<8x128xf32>
    %c6_21 = arith.constant 6 : index
    %80 = memref.load %arg3[%c6_21] : memref<10xf32, #tpu.memory_space<smem>>
    %81 = vector.broadcast %80 : f32 to vector<8x128xf32>
    %82 = arith.addf %79, %81 : vector<8x128xf32>
    %cst_22 = arith.constant 0.000000e+00 : f32
    %83 = vector.broadcast %cst_22 : f32 to vector<8x128xf32>
    %84 = arith.maximumf %82, %83 : vector<8x128xf32>
    %c6_23 = arith.constant 6 : index
    %85 = memref.load %arg4[%c6_23] : memref<10xf32, #tpu.memory_space<smem>>
    %86 = vector.broadcast %85 : f32 to vector<8x128xf32>
    %87 = arith.mulf %84, %86 : vector<8x128xf32>
    %88 = arith.addf %76, %87 : vector<8x128xf32>
    %c7 = arith.constant 7 : index
    %89 = memref.load %arg2[%c7] : memref<10xf32, #tpu.memory_space<smem>>
    %90 = vector.broadcast %89 : f32 to vector<8x128xf32>
    %91 = arith.mulf %90, %0 : vector<8x128xf32>
    %c7_24 = arith.constant 7 : index
    %92 = memref.load %arg3[%c7_24] : memref<10xf32, #tpu.memory_space<smem>>
    %93 = vector.broadcast %92 : f32 to vector<8x128xf32>
    %94 = arith.addf %91, %93 : vector<8x128xf32>
    %cst_25 = arith.constant 0.000000e+00 : f32
    %95 = vector.broadcast %cst_25 : f32 to vector<8x128xf32>
    %96 = arith.maximumf %94, %95 : vector<8x128xf32>
    %c7_26 = arith.constant 7 : index
    %97 = memref.load %arg4[%c7_26] : memref<10xf32, #tpu.memory_space<smem>>
    %98 = vector.broadcast %97 : f32 to vector<8x128xf32>
    %99 = arith.mulf %96, %98 : vector<8x128xf32>
    %100 = arith.addf %88, %99 : vector<8x128xf32>
    %c8 = arith.constant 8 : index
    %101 = memref.load %arg2[%c8] : memref<10xf32, #tpu.memory_space<smem>>
    %102 = vector.broadcast %101 : f32 to vector<8x128xf32>
    %103 = arith.mulf %102, %0 : vector<8x128xf32>
    %c8_27 = arith.constant 8 : index
    %104 = memref.load %arg3[%c8_27] : memref<10xf32, #tpu.memory_space<smem>>
    %105 = vector.broadcast %104 : f32 to vector<8x128xf32>
    %106 = arith.addf %103, %105 : vector<8x128xf32>
    %cst_28 = arith.constant 0.000000e+00 : f32
    %107 = vector.broadcast %cst_28 : f32 to vector<8x128xf32>
    %108 = arith.maximumf %106, %107 : vector<8x128xf32>
    %c8_29 = arith.constant 8 : index
    %109 = memref.load %arg4[%c8_29] : memref<10xf32, #tpu.memory_space<smem>>
    %110 = vector.broadcast %109 : f32 to vector<8x128xf32>
    %111 = arith.mulf %108, %110 : vector<8x128xf32>
    %112 = arith.addf %100, %111 : vector<8x128xf32>
    %c9 = arith.constant 9 : index
    %113 = memref.load %arg2[%c9] : memref<10xf32, #tpu.memory_space<smem>>
    %114 = vector.broadcast %113 : f32 to vector<8x128xf32>
    %115 = arith.mulf %114, %0 : vector<8x128xf32>
    %c9_30 = arith.constant 9 : index
    %116 = memref.load %arg3[%c9_30] : memref<10xf32, #tpu.memory_space<smem>>
    %117 = vector.broadcast %116 : f32 to vector<8x128xf32>
    %118 = arith.addf %115, %117 : vector<8x128xf32>
    %cst_31 = arith.constant 0.000000e+00 : f32
    %119 = vector.broadcast %cst_31 : f32 to vector<8x128xf32>
    %120 = arith.maximumf %118, %119 : vector<8x128xf32>
    %c9_32 = arith.constant 9 : index
    %121 = memref.load %arg4[%c9_32] : memref<10xf32, #tpu.memory_space<smem>>
    %122 = vector.broadcast %121 : f32 to vector<8x128xf32>
    %123 = arith.mulf %120, %122 : vector<8x128xf32>
    %124 = arith.addf %112, %123 : vector<8x128xf32>
    %c0_33 = arith.constant 0 : index
    %c0_34 = arith.constant 0 : index
    %125 = vector.load %arg6[%c0_33, %c0_34] : memref<8x128xf32, #tpu.memory_space<vmem>>, vector<8x128xf32>
    tpu.vector_store %arg6[%c0_33, %c0_34], %124 {strides = array<i32>} : memref<8x128xf32, #tpu.memory_space<vmem>>, vector<8x128xf32>,
    return
  }
  func.func @transform_0(%arg0: i32) -> (i32, i32) {
    %c0_i32 = arith.constant 0 : i32
    %c0_i32_0 = arith.constant 0 : i32
    return %arg0, %c0_i32 : i32, i32
  }
  func.func @transform_1(%arg0: i32) -> i32 {
    %c0_i32 = arith.constant 0 : i32
    %c0_i32_0 = arith.constant 0 : i32
    return %c0_i32 : i32
  }
  func.func @transform_2(%arg0: i32) -> i32 {
    %c0_i32 = arith.constant 0 : i32
    %c0_i32_0 = arith.constant 0 : i32
    return %c0_i32 : i32
  }
  func.func @transform_3(%arg0: i32) -> i32 {
    %c0_i32 = arith.constant 0 : i32
    %c0_i32_0 = arith.constant 0 : i32
    return %c0_i32 : i32
  }
  func.func @transform_4(%arg0: i32) -> i32 {
    %c0_i32 = arith.constant 0 : i32
    %c0_i32_0 = arith.constant 0 : i32
    return %c0_i32 : i32
  }
  func.func @transform_5(%arg0: i32) -> (i32, i32) {
    %c0_i32 = arith.constant 0 : i32
    %c0_i32_0 = arith.constant 0 : i32
    return %arg0, %c0_i32 : i32, i32
  }
}

</mosaic_0001>

<bundles_post_ra>
// kernel: _net_forward.1
= control target key start
LH: loop header
LB: loop body
LE: loop exit
PB: predicated region body
PF: predicated region fallthrough
CT: control target
= control target key end

     0   :  { %11 = vsyncpa [#allocation4], 0  ;;  %s332_s0 = inlined_call_operand.vmem [shape: f32[8,128], index: 0, kind: input, shape index: {}]   ;;  %s333_s1 = inlined_call_operand.vmem [shape: f32[10], index: 1, kind: input, shape index: {}]   ;;  %s334_s2 = inlined_call_operand.vmem [shape: f32[10], index: 2, kind: input, shape index: {}]   ;;  %s335_s3 = inlined_call_operand.vmem [shape: f32[10], index: 3, kind: input, shape index: {}]   ;;  %s336_s4 = inlined_call_operand.<no memory space> [shape: f32[1], index: 4, kind: input, shape index: {}]   ;;  %s337_s5 = inlined_call_operand.vmem [shape: f32[8,128], index: 5, kind: output, shape index: {}]  }
   0x1   :  { %12 = vsyncpa [#allocation6], 0  ;;  %s31_s20 = sshll.u32 %s334_s2, 4  ;;  %s21_s23 = sshll.u32 %s333_s1, 4  ;;  %s32_s20 = int_to_ptr.vmem [resolvable:$true] %s31_s20  ;;  %s22_s23 = int_to_ptr.vmem [resolvable:$true] %s21_s23 }
   0x2   :  { %s208_s24 = scalar_lea.vmem %s32_s20, 16  ;;  %p213_p1 = scmp.lt.s32.totalorder %s32_s20, %s32_s20 }
   0x3   :  { %p209_p0 = scmp.ne.s32.totalorder %s32_s20, %s208_s24  ;;  %p214_p2 = scmp.lt.s32.totalorder %s208_s24, %s208_s24 }
   0x5   :  { %p215_p3 = por %p214_p2, %p213_p1 }
   0x7   :  { %p216_p4 = pnand %p215_p3, %p209_p0 }
   0x9   :  { %219 = shalt.err (!%p216_p4)
}
   0xa   :  { %s248_s25 = smov [#allocation5]   ;;  %s220_s26 = scalar_lea.vmem %s22_s23, 16 }
   0xb   :  { %34 = dma.vmem_to_smem %s32_s20, 16, %s248_s25, [#allocation6]  }
   0xc   :  { %p221_p5 = scmp.ne.s32.totalorder %s22_s23, %s220_s26  ;;  %p225_p6 = scmp.lt.s32.totalorder %s22_s23, %s22_s23 }
   0xd   :  { %p226_p7 = scmp.lt.s32.totalorder %s220_s26, %s220_s26 }
   0xf   :  { %p227_p8 = por %p226_p7, %p225_p6 }
  0x11   :  { %p228_p9 = pnand %p227_p8, %p221_p5 }
  0x13   :  { %231 = shalt.err (!%p228_p9)
}
  0x14   :  { %s249_s2 = smov [#allocation3]   ;;  %s41_s28 = sshll.u32 %s335_s3, 4  ;;  %s42_s28 = int_to_ptr.vmem [resolvable:$true] %s41_s28 }
  0x15   :  { %24 = dma.vmem_to_smem %s22_s23, 16, %s249_s2, [#allocation4]  }
  0x16   :  { %s232_s29 = scalar_lea.vmem %s42_s28, 16  ;;  %p237_p11 = scmp.lt.s32.totalorder %s42_s28, %s42_s28 }
  0x17   :  { %p233_p10 = scmp.ne.s32.totalorder %s42_s28, %s232_s29  ;;  %p238_p12 = scmp.lt.s32.totalorder %s232_s29, %s232_s29 }
  0x19   :  { %p239_p13 = por %p238_p12, %p237_p11 }
  0x1b   :  { %p240_p0 = pnand %p239_p13, %p233_p10 }
  0x1d   :  { %243 = shalt.err (!%p240_p0)
}
  0x1e   :  { %s250_s30 = smov [#allocation7]  }
  0x1f   :  { %44 = dma.vmem_to_smem %s42_s28, 16, %s250_s30, [#allocation6]  }
  0x20   :  { %244 = dma.done.wait [#allocation4], 16  }
  0x21   :  { %245 = vsyncadd [#allocation4], 4294967280 }
  0x22   :  { %246 = dma.done.wait [#allocation6], 32  }
  0x23   :  { %247 = vsyncadd [#allocation6], 4294967264 }
  0x24   :  { %56 = sfence }
  0x25   :  { %s61_s6 = sld [smem:[#allocation3]]  ;;  %v293_v0 = vld [vmem:[%s332_s0] sm:$0xff]  ;;  %v59_v10 = vstv %s336_s4 }
  0x26   :  { %s64_s7 = sld [smem:[#allocation5]] }
  0x27   :  { %s68_s8 = sld [smem:[#allocation7]] }
  0x28   :  { %s178_s9 = sld [smem:[#allocation3 + $0x1]] }
  0x29   :  { %s179_s11 = sld [smem:[#allocation5 + $0x1]] }
  0x2a   :  { %s295_s12 = sld [smem:[#allocation7 + $0x1]] }
  0x2b   :  { %v62_v1 = vstv %s61_s6  ;;  %s181_s13 = sld [smem:[#allocation3 + $0x2]] }
  0x2c   :  { %v63_v2 = vmul.f32 %v62_v1, %v293_v0  ;;  %v65_v3 = vstv %s64_s7  ;;  %s182_s14 = sld [smem:[#allocation5 + $0x2]] }
  0x2d   :  { %s298_s15 = sld [smem:[#allocation7 + $0x2]]  ;;  %v69_v6 = vstv %s68_s8 }
  0x2e   :  { %v66_v4 = vadd.f32 %v65_v3, %v63_v2  ;;  %v73_v5 = vstv %s178_s9  ;;  %s184_s16 = sld [smem:[#allocation3 + $0x3]] }
  0x2f   :  { %v74_v7 = vmul.f32 %v73_v5, %v293_v0  ;;  %v76_v8 = vstv %s179_s11  ;;  %s185_s0 = sld [smem:[#allocation5 + $0x3]] }
  0x30   :  { %v67_v9 = vmax.f32 %v66_v4, 0.0  ;;  %s301_s17 = sld [smem:[#allocation7 + $0x3]]  ;;  %v80_v14 = vstv %s295_s12 }
  0x31   :  { %v77_v11 = vadd.f32 %v76_v8, %v74_v7  ;;  %v84_v12 = vstv %s181_s13  ;;  %s187_s20 = sld [smem:[#allocation3 + $0x4]] }
  0x32   :  { %v70_v13 = vmul.f32 %v69_v6, %v67_v9  ;;  %v85_v15 = vmul.f32 %v84_v12, %v293_v0  ;;  %v87_v16 = vstv %s182_s14  ;;  %s188_s21 = sld [smem:[#allocation5 + $0x4]] }
  0x33   :  { %v78_v17 = vmax.f32 %v77_v11, 0.0  ;;  %s308_s22 = sld [smem:[#allocation7 + $0x4]]  ;;  %v91_v22 = vstv %s298_s15 }
  0x34   :  { %v71_v18 = vadd.f32 %v70_v13, %v59_v10  ;;  %v88_v19 = vadd.f32 %v87_v16, %v85_v15  ;;  %v95_v20 = vstv %s184_s16  ;;  %s190_s23 = sld [smem:[#allocation3 + $0x5]] }
  0x35   :  { %v81_v21 = vmul.f32 %v80_v14, %v78_v17  ;;  %v96_v23 = vmul.f32 %v95_v20, %v293_v0  ;;  %v98_v24 = vstv %s185_s0  ;;  %s191_s4 = sld [smem:[#allocation5 + $0x5]] }
  0x36   :  { %v89_v25 = vmax.f32 %v88_v19, 0.0  ;;  %s312_s24 = sld [smem:[#allocation7 + $0x5]]  ;;  %v102_v30 = vstv %s301_s17 }
  0x37   :  { %v82_v26 = vadd.f32 %v81_v21, %v71_v18  ;;  %v99_v27 = vadd.f32 %v98_v24, %v96_v23  ;;  %v106_v28 = vstv %s187_s20  ;;  %s193_s25 = sld [smem:[#allocation3 + $0x6]] }
  0x38   :  { %v92_v29 = vmul.f32 %v91_v22, %v89_v25  ;;  %v107_v31 = vmul.f32 %v106_v28, %v293_v0  ;;  %v109_v32 = vstv %s188_s21  ;;  %s194_s26 = sld [smem:[#allocation5 + $0x6]] }
  0x39   :  { %v100_v33 = vmax.f32 %v99_v27, 0.0  ;;  %s316_s2 = sld [smem:[#allocation7 + $0x6]]  ;;  %v113_v38 = vstv %s308_s22 }
  0x3a   :  { %v93_v34 = vadd.f32 %v92_v29, %v82_v26  ;;  %v110_v35 = vadd.f32 %v109_v32, %v107_v31  ;;  %v117_v36 = vstv %s190_s23  ;;  %s196_s1 = sld [smem:[#allocation3 + $0x7]] }
  0x3b   :  { %v103_v37 = vmul.f32 %v102_v30, %v100_v33  ;;  %v118_v39 = vmul.f32 %v117_v36, %v293_v0  ;;  %v120_v40 = vstv %s191_s4  ;;  %s197_s27 = sld [smem:[#allocation5 + $0x7]] }
  0x3c   :  { %v111_v41 = vmax.f32 %v110_v35, 0.0  ;;  %s320_s28 = sld [smem:[#allocation7 + $0x7]]  ;;  %v124_v46 = vstv %s312_s24 }
  0x3d   :  { %v104_v42 = vadd.f32 %v103_v37, %v93_v34  ;;  %v121_v43 = vadd.f32 %v120_v40, %v118_v39  ;;  %v128_v44 = vstv %s193_s25  ;;  %s199_s29 = sld [smem:[#allocation3 + $0x8]] }
  0x3e   :  { %v114_v45 = vmul.f32 %v113_v38, %v111_v41  ;;  %v129_v47 = vmul.f32 %v128_v44, %v293_v0  ;;  %v131_v48 = vstv %s194_s26  ;;  %s200_s30 = sld [smem:[#allocation5 + $0x8]] }
  0x3f   :  { %v122_v49 = vmax.f32 %v121_v43, 0.0  ;;  %s201_s6 = sld [smem:[#allocation7 + $0x8]]  ;;  %v135_v54 = vstv %s316_s2 }
  0x40   :  { %v115_v50 = vadd.f32 %v114_v45, %v104_v42  ;;  %v132_v51 = vadd.f32 %v131_v48, %v129_v47  ;;  %v139_v52 = vstv %s196_s1  ;;  %s202_s7 = sld [smem:[#allocation3 + $0x9]] }
  0x41   :  { %v125_v53 = vmul.f32 %v124_v46, %v122_v49  ;;  %v140_v55 = vmul.f32 %v139_v52, %v293_v0  ;;  %v142_v56 = vstv %s197_s27  ;;  %s203_s8 = sld [smem:[#allocation5 + $0x9]] }
  0x42   :  { %v133_v57 = vmax.f32 %v132_v51, 0.0  ;;  %s204_s9 = sld [smem:[#allocation7 + $0x9]]  ;;  %v146_v62 = vstv %s320_s28 }
  0x43   :  { %v126_v58 = vadd.f32 %v125_v53, %v115_v50  ;;  %v143_v59 = vadd.f32 %v142_v56, %v140_v55  ;;  %v150_v60 = vstv %s199_s29 }
  0x44   :  { %v136_v61 = vmul.f32 %v135_v54, %v133_v57  ;;  %v151_v63 = vmul.f32 %v150_v60, %v293_v0  ;;  %v153_v1 = vstv %s200_s30 }
  0x45   :  { %v144_v2 = vmax.f32 %v143_v59, 0.0  ;;  %v157_v7 = vstv %s201_s6 }
  0x46   :  { %v137_v3 = vadd.f32 %v136_v61, %v126_v58  ;;  %v154_v4 = vadd.f32 %v153_v1, %v151_v63  ;;  %v161_v5 = vstv %s202_s7 }
  0x47   :  { %v147_v6 = vmul.f32 %v146_v62, %v144_v2  ;;  %v162_v8 = vmul.f32 %v161_v5, %v293_v0  ;;  %v164_v9 = vstv %s203_s8 }
  0x48   :  { %v155_v10 = vmax.f32 %v154_v4, 0.0  ;;  %v168_v14 = vstv %s204_s9 }
  0x49   :  { %v148_v11 = vadd.f32 %v147_v6, %v137_v3  ;;  %v165_v12 = vadd.f32 %v164_v9, %v162_v8 }
  0x4a   :  { %v158_v13 = vmul.f32 %v157_v7, %v155_v10 }
  0x4b   :  { %v166_v15 = vmax.f32 %v165_v12, 0.0 }
  0x4c   :  { %v159_v16 = vadd.f32 %v158_v13, %v148_v11 }
  0x4d   :  { %v169_v17 = vmul.f32 %v168_v14, %v166_v15 }
  0x4f   :  { %v170_v18 = vadd.f32 %v169_v17, %v159_v16 }
  0x51   :  { %171 = vst [vmem:[%s337_s5] sm:$0xff] %v170_v18 }
  0x52   :  { %176 = vsyncpa [#allocation4], 1 }
  0x53   :  { %177 = vsyncpa [#allocation6], 1 }

</bundles_post_ra>
